<compile_context>
chip_gen: v7x
topology: tpu7x:2x2x1
jax: 0.10.0
libtpu: 0.0.40
codegen_flags: <defaults>
</compile_context>

<pallas_src>
import jax
import jax.numpy as jnp
from jax.experimental import pallas as pl
from jax.experimental.pallas import tpu as pltpu


def _variant_sigmoid_kernel(alpha_ref, x_ref, o_ref):
    alpha = alpha_ref[0]                        # scalar from SMEM
    x = x_ref[...].astype(jnp.float32)          # f32 compute (safe on v5e too)
    # sigmoid(alpha * x) == 0.5 * (tanh(0.5 * alpha * x) + 1): one EUP op/elem.
    y = 0.5 * (jnp.tanh((0.5 * alpha) * x) + 1.0)
    o_ref[...] = y.astype(o_ref.dtype)


def _pick_cols(total):
    """Largest lane-dense width (multiple of 128) dividing `total` exactly."""
    for c in (1024, 512, 256, 128):
        if total >= c and total % c == 0:
            return c
    return None


@jax.jit
def variant_sigmoid(x, alpha):
    orig_shape = x.shape
    orig_dtype = x.dtype
    total = x.size
    if total == 0:                       # empty-tensor edge case: nothing to do
        return x

    flat = x.reshape(-1)
    alpha_arr = jnp.asarray(alpha, dtype=jnp.float32).reshape(1)

    cols = _pick_cols(total)
    if cols is None:
        # Uncommon ragged element count: pad the flat tail once (small copy)
        # to reach a lane-dense multiple of 128 / 1024.
        cols = 128 if total < 1024 else 1024
        padded_total = pl.cdiv(total, cols) * cols
        flat = jnp.pad(flat, (0, padded_total - total))
    else:
        padded_total = total

    rows = padded_total // cols
    x2 = flat.reshape(rows, cols)

    # Row tile: ~2 MiB f32 at cols=1024, and >=2 grid steps when there are
    # enough rows (helps v7x's two TensorCores). Ragged last block is masked
    # by Pallas, so rows need not divide evenly.
    TM = 512
    if rows <= 8:
        tm = rows                                   # single block == full dim
    elif rows <= 2 * TM:
        tm = ((pl.cdiv(rows, 2) + 7) // 8) * 8      # ~2 blocks, multiple of 8
    else:
        tm = TM
    grid = (pl.cdiv(rows, tm),)

    itemsize = jnp.dtype(orig_dtype).itemsize
    cost = pl.CostEstimate(
        flops=3 * padded_total,
        transcendentals=padded_total,
        bytes_accessed=2 * padded_total * itemsize + 4,
    )

    out = pl.pallas_call(
        _variant_sigmoid_kernel,
        out_shape=jax.ShapeDtypeStruct((rows, cols), orig_dtype),
        grid=grid,
        in_specs=[
            pl.BlockSpec(memory_space=pltpu.SMEM),        # alpha scalar
            pl.BlockSpec((tm, cols), lambda i: (i, 0)),   # lane-dense x tile
        ],
        out_specs=pl.BlockSpec((tm, cols), lambda i: (i, 0)),
        compiler_params=pltpu.CompilerParams(
            dimension_semantics=("parallel",),
        ),
        cost_estimate=cost,
    )(alpha_arr, x2)

    out_flat = out.reshape(-1)
    if padded_total != total:
        out_flat = out_flat[:total]
    return out_flat.reshape(orig_shape)


if __name__ == "__main__":
    key = jax.random.PRNGKey(0)
    # Small NCHW-shaped input, consistent with typical conv-activation usage.
    x = jax.random.normal(key, (2, 4, 16, 16), dtype=jnp.float32)
    alpha = 2.0

    y = variant_sigmoid(x, alpha)
    y = jax.block_until_ready(y)

    # Reference check in plain JAX (exp-based, matching the PyTorch module).
    y_ref = 1.0 / (1.0 + jnp.exp(-alpha * x))
    assert y.shape == x.shape and y.dtype == x.dtype
    assert jnp.allclose(y, y_ref, atol=2e-6, rtol=2e-6)

    print("KERNEL_OK")
</pallas_src>

<mosaic_0001>
module attributes {stable_mosaic.version = 11 : i64} {
  func.func @_variant_sigmoid_kernel(%arg0: i32, %arg1: memref<1xf32, #tpu.memory_space<smem>>, %arg2: memref<2x1024xf32, #tpu.memory_space<vmem>>, %arg3: memref<2x1024xf32, #tpu.memory_space<vmem>>) attributes {dimension_semantics = [#tpu.dimension_semantics<parallel>], iteration_bounds = array<i64: 1>, scalar_prefetch = 0 : i64, scratch_operands = 0 : i64, tpu.core_type = #tpu.core_type<tc>, window_params = [{transform_indices = @transform_0, window_bounds = array<i64: 1>}, {transform_indices = @transform_1, window_bounds = array<i64: 2, 1024>}, {transform_indices = @transform_2, window_bounds = array<i64: 2, 1024>}]} {
    %c0 = arith.constant 0 : index
    %0 = memref.load %arg1[%c0] : memref<1xf32, #tpu.memory_space<smem>>
    %c0_0 = arith.constant 0 : index
    %c0_1 = arith.constant 0 : index
    %1 = vector.load %arg2[%c0_0, %c0_1] : memref<2x1024xf32, #tpu.memory_space<vmem>>, vector<2x1024xf32>
    %cst = arith.constant 5.000000e-01 : f32
    %2 = arith.mulf %cst, %0 : f32
    %3 = vector.broadcast %2 : f32 to vector<2x1024xf32>
    %4 = arith.mulf %3, %1 : vector<2x1024xf32>
    %5 = math.tanh %4 : vector<2x1024xf32>
    %cst_2 = arith.constant 1.000000e+00 : f32
    %6 = vector.broadcast %cst_2 : f32 to vector<2x1024xf32>
    %7 = arith.addf %5, %6 : vector<2x1024xf32>
    %cst_3 = arith.constant 5.000000e-01 : f32
    %8 = vector.broadcast %cst_3 : f32 to vector<2x1024xf32>
    %9 = arith.mulf %8, %7 : vector<2x1024xf32>
    %c0_4 = arith.constant 0 : index
    %c0_5 = arith.constant 0 : index
    %10 = vector.load %arg3[%c0_4, %c0_5] : memref<2x1024xf32, #tpu.memory_space<vmem>>, vector<2x1024xf32>
    tpu.vector_store %arg3[%c0_4, %c0_5], %9 {strides = array<i32>} : memref<2x1024xf32, #tpu.memory_space<vmem>>, vector<2x1024xf32>,
    return
  }
  func.func @transform_0(%arg0: i32) -> i32 {
    %c0_i32 = arith.constant 0 : i32
    %c0_i32_0 = arith.constant 0 : i32
    return %c0_i32 : i32
  }
  func.func @transform_1(%arg0: i32) -> (i32, i32) {
    %c0_i32 = arith.constant 0 : i32
    %c0_i32_0 = arith.constant 0 : i32
    return %arg0, %c0_i32 : i32, i32
  }
  func.func @transform_2(%arg0: i32) -> (i32, i32) {
    %c0_i32 = arith.constant 0 : i32
    %c0_i32_0 = arith.constant 0 : i32
    return %arg0, %c0_i32 : i32, i32
  }
}

</mosaic_0001>

<bundles_post_ra>
// kernel: variant_sigmoid.1
= control target key start
LH: loop header
LB: loop body
LE: loop exit
PB: predicated region body
PF: predicated region fallthrough
CT: control target
= control target key end

     0   :  { %s65_s0 = inlined_call_operand.<no memory space> [shape: f32[1], index: 0, kind: input, shape index: {}]   ;;  %s66_s1 = inlined_call_operand.vmem [shape: f32[2,1024], index: 1, kind: input, shape index: {}]   ;;  %s67_s2 = inlined_call_operand.vmem [shape: f32[2,1024], index: 2, kind: output, shape index: {}]  }
   0x1   :  { %v13_v0 = vld [vmem:[%s66_s1] sm:$0xff]  ;;  %s15_s13 = smul.f32 0.5, %s65_s0  ;;  %v14_v1 = vld [vmem:[%s66_s1 + $0x8] sm:$0xff] }
   0x3   :  { %v16_v2 = vstv %s15_s13 }
   0x4   :  { %v17_v3 = vmul.f32 %v16_v2, %v13_v0  ;;  %v18_v4 = vmul.f32 %v16_v2, %v14_v1 }
   0x6   :  { %31 = vtanh.f32 %v17_v3 }
   0x7   :  { %33 = vtanh.f32 %v18_v4 }
  0x10   :  { %v32_v5 = vpop.eup %31 }
  0x11   :  { %v34_v6 = vpop.eup %33  ;;  %v21_v7 = vadd.f32 1.0, %v32_v5 }
  0x12   :  { %v22_v8 = vadd.f32 1.0, %v34_v6 }
  0x13   :  { %v23_v9 = vmul.f32 0.5, %v21_v7 }
  0x14   :  { %v24_v10 = vmul.f32 0.5, %v22_v8 }
  0x15   :  { %25 = vst [vmem:[%s67_s2] sm:$0xff] %v23_v9 }
  0x16   :  { %26 = vst [vmem:[%s67_s2 + $0x8] sm:$0xff] %v24_v10 }

</bundles_post_ra>
